<compile_context>
chip_gen: v7x
topology: tpu7x:2x2x1
jax: 0.10.0
libtpu: 0.0.40
codegen_flags: <defaults>
</compile_context>

<pallas_src>
import functools

import numpy as np
import jax
import jax.numpy as jnp
from jax.experimental import pallas as pl
from jax.experimental.pallas import tpu as pltpu

LOG_SQRT_2PI = 0.5 * float(np.log(2.0 * np.pi))


# ----------------------------------------------------------------------------
# VPSDE (cosine schedule) scalar math — numpy (static precompute) and JAX (ref)
# ----------------------------------------------------------------------------
def _beta_cosine_np(t, beta_min=0.1, beta_max=20.0, T=1.0, s=0.008):
    f = (t / T + s) / (1.0 + s)
    beta_t = 2.0 * np.pi / (T * (1.0 + s)) * np.tan(f * (np.pi / 2.0))
    return np.clip(beta_t, beta_min, beta_max)


def _sigma_cosine_np(t, T=1.0, s=0.008):
    f = (t / T + s) / (1.0 + s)
    coeff = np.cos(f * (np.pi / 2.0)) / np.cos(s / (1.0 + s) * (np.pi / 2.0))
    return np.sqrt(1.0 - coeff ** 2)


def beta_cosine(t, beta_min=0.1, beta_max=20.0, T=1.0, s=0.008):
    f = (t / T + s) / (1.0 + s)
    beta_t = 2.0 * np.pi / (T * (1.0 + s)) * jnp.tan(f * (np.pi / 2.0))
    return jnp.clip(beta_t, beta_min, beta_max)


def sigma_cosine(t, T=1.0, s=0.008):
    f = (t / T + s) / (1.0 + s)
    coeff = jnp.cos(f * (np.pi / 2.0)) / np.cos(s / (1.0 + s) * (np.pi / 2.0))
    return jnp.sqrt(1.0 - coeff ** 2)


def _precompute_schedule(steps, F, epsilon, T):
    """Static per-step scalar table (5, S_active) + indices of active steps.

    Per active step k (dt = -1/(steps+1); t accumulated in float32 like the
    reference loop):
      a       = 1 + 0.5*beta*dt                   (x_mean_pb = a*x)
      neg_bs  = -(beta*dt/sigma) * (1 + 0.1*t)    (bcoef * score-scale folded
                                                   into the weight in-kernel)
      std     = sqrt(beta)*sqrt(|dt|)
      inv_var = 1/std^2
      const   = -F*(log(std) + log(sqrt(2*pi)))   (per-sample log-prob const)
    """
    dt = -1.0 / (steps + 1)
    sqrt_abs_dt = np.sqrt(abs(dt))
    t = np.float32(T)
    t_vals, idx = [], []
    for k in range(steps):
        t = np.float32(t + np.float32(dt))
        if float(t) >= epsilon:           # static: t_k is fully deterministic
            t_vals.append(float(t))
            idx.append(k)
    if not t_vals:
        return np.zeros((5, 0), np.float32), np.zeros((0,), np.int32)
    t_act = np.asarray(t_vals, dtype=np.float64)
    beta = _beta_cosine_np(t_act, T=T)
    sigma = _sigma_cosine_np(t_act, T=T)
    a = 1.0 + 0.5 * beta * dt
    neg_bs = -(beta * dt / sigma) * (1.0 + 0.1 * t_act)
    std = np.sqrt(beta) * sqrt_abs_dt
    inv_var = 1.0 / (std * std)
    const = -float(F) * (np.log(std) + LOG_SQRT_2PI)
    params = np.stack([a, neg_bs, std, inv_var, const]).astype(np.float32)
    return params, np.asarray(idx, dtype=np.int32)


# ----------------------------------------------------------------------------
# Fused kernel: score matmul + SDE step + log-prob accumulation, per grid step.
# Grid = (batch_tiles, active_steps); x / logpb / logpf are resident outputs.
# ----------------------------------------------------------------------------
def _rtb_fused_kernel(save_traj, neg_F_log_c,
                      params_ref, x0_ref, noise_ref, w_ref, b_ref,
                      x_ref, lpb_ref, lpf_ref, *traj_refs):
    s = pl.program_id(1)

    @pl.when(s == 0)
    def _init():
        # resident state: x <- x0, logpb/logpf <- N(0,1).log_prob(x0).sum()
        x0 = x0_ref[...]                                      # (TB, C, HW)
        lp0 = -0.5 * jnp.sum(x0 * x0, axis=(1, 2), keepdims=True) + neg_F_log_c
        x_ref[...] = x0
        lpb_ref[...] = lp0
        lpf_ref[...] = lp0

    # per-step scalars from the static SMEM schedule (no divides in-kernel)
    a = params_ref[0, s]
    neg_bs = params_ref[1, s]
    std = params_ref[2, s]
    inv_var = params_ref[3, s]
    const = params_ref[4, s]

    x = x_ref[...]                                            # (TB, C, HW) f32
    eps = noise_ref[0].astype(jnp.float32)                    # upcast if bf16
    tb = x.shape[0]

    # Surrogate score network with the step scalars folded into the weight:
    #   -bcoef*score = (-bs*W) @ x_c + (-bs*b),  bs = bcoef*(1 + 0.1 t)
    w_s = neg_bs * w_ref[...]                                 # (C, C), tiny
    b_s = neg_bs * b_ref[...]                                 # (C, 1), tiny
    neg_bscore = jnp.einsum(
        'bcd,bdk->bck', jnp.broadcast_to(w_s[None], (tb,) + w_s.shape), x,
        preferred_element_type=jnp.float32) + b_s[None]

    # Euler–Maruyama step (algebraically simplified, std*eps computed once):
    #   d_pb  = std*eps - bcoef*score ;  x_new = a*x + d_pb ;  d_pf = std*eps
    se = std * eps
    d_pb = se + neg_bscore
    x_new = a * x + d_pb

    # log-prob increments (Normal(mean, std) summed over all latent dims)
    lpf_ref[...] += -0.5 * jnp.sum(eps * eps, axis=(1, 2), keepdims=True) + const
    lpb_ref[...] += (-0.5 * inv_var) * jnp.sum(d_pb * d_pb, axis=(1, 2),
                                               keepdims=True) + const

    x_ref[...] = x_new
    if save_traj:
        traj_refs[0][0] = x_new.astype(traj_refs[0].dtype)


# ----------------------------------------------------------------------------
# RTBModel.forward equivalent (single jitted call, single pallas_call)
# ----------------------------------------------------------------------------
def _pick_batch_tile(B, C, HW):
    """Largest divisor of B that (a) leaves >=2 batch tiles when B >= 2 so the
    'parallel' axis keeps both v7x TensorCores busy, and (b) keeps ~8 in-flight
    tile-sized pipeline buffers per batch element under a conservative VMEM
    budget (fits v7x's 64 MiB / v5e's raised scoped limit)."""
    bytes_per_b = C * HW * 4
    max_tb = max(1, (24 << 20) // (8 * bytes_per_b))
    cap = B if B < 2 else max(1, B // 2)
    tb = 1
    for d in range(1, B + 1):
        if B % d == 0 and d <= max_tb and d <= cap:
            tb = d
    return tb


@functools.partial(jax.jit,
                   static_argnames=("steps", "save_traj", "epsilon", "T",
                                    "stream_dtype"))
def rtb_forward(x0, noise, w, bias, *, steps, save_traj=True, epsilon=1e-5,
                T=1.0, stream_dtype=jnp.float32):
    B, C, H, W_ = x0.shape
    HW = H * W_
    F = C * HW
    x3 = x0.reshape(B, C, HW).astype(jnp.float32)

    params_np, act_idx = _precompute_schedule(steps, F, epsilon, T)
    S = params_np.shape[1]

    if S == 0:  # degenerate: every step below epsilon cutoff
        lp0 = jnp.sum(-0.5 * x3 * x3, axis=(1, 2)) - F * LOG_SQRT_2PI
        return {'x_mean_posterior': x0, 'logpf_prior': lp0,
                'logpf_posterior': lp0,
                'traj': x0[None] if save_traj else None}

    noise4 = noise.reshape(steps, B, C, HW)
    noise_act = (noise4 if S == steps
                 else noise4[np.asarray(act_idx)]).astype(stream_dtype)

    params = jnp.asarray(params_np)                      # (5, S) -> SMEM table
    w2 = w.astype(jnp.float32).reshape(C, C)
    b2 = bias.astype(jnp.float32).reshape(C, 1)

    TB = _pick_batch_tile(B, C, HW)
    n_bt = B // TB

    # Explicit scoped-VMEM limit: ~8 in-flight tile buffers + slack.
    # (v5e default is 16 MiB; v7x physical cap is 64 MiB — never exceed it.)
    vmem_limit = int(min(max(8 * TB * C * HW * 4 + (2 << 20), 32 << 20),
                         64 << 20))

    kernel = functools.partial(_rtb_fused_kernel, save_traj,
                               -float(F) * LOG_SQRT_2PI)

    out_shape = [
        jax.ShapeDtypeStruct((B, C, HW), jnp.float32),   # final x (resident)
        jax.ShapeDtypeStruct((B, 1, 1), jnp.float32),    # logpb (resident acc)
        jax.ShapeDtypeStruct((B, 1, 1), jnp.float32),    # logpf (resident acc)
    ]
    out_specs = [
        pl.BlockSpec((TB, C, HW), lambda bi, s: (bi, 0, 0)),
        pl.BlockSpec((TB, 1, 1), lambda bi, s: (bi, 0, 0)),
        pl.BlockSpec((TB, 1, 1), lambda bi, s: (bi, 0, 0)),
    ]
    if save_traj:
        out_shape.append(jax.ShapeDtypeStruct((S, B, C, HW), stream_dtype))
        out_specs.append(pl.BlockSpec((1, TB, C, HW),
                                      lambda bi, s: (s, bi, 0, 0)))

    results = pl.pallas_call(
        kernel,
        out_shape=tuple(out_shape),
        grid=(n_bt, S),
        in_specs=[
            # static per-step scalar schedule, whole (5,S) table in SMEM
            pl.BlockSpec(memory_space=pltpu.MemorySpace.SMEM),
            # x0: step-invariant (same block index for every s) -> DMA'd once
            pl.BlockSpec((TB, C, HW), lambda bi, s: (bi, 0, 0)),
            # noise[s]: streamed per step, pipelined against compute
            pl.BlockSpec((1, TB, C, HW), lambda bi, s: (s, bi, 0, 0)),
            # W / bias: single resident (C,C)/(C,1) blocks (weight-stationary)
            pl.BlockSpec((C, C), lambda bi, s: (0, 0)),
            pl.BlockSpec((C, 1), lambda bi, s: (0, 0)),
        ],
        out_specs=tuple(out_specs),
        compiler_params=pltpu.CompilerParams(
            dimension_semantics=("parallel", "arbitrary"),
            vmem_limit_bytes=vmem_limit),
    )(params, x3, noise_act, w2, b2)

    if save_traj:
        x_fin, lpb, lpf, traj = results
        traj_full = jnp.concatenate(
            [x0[None].astype(jnp.float32),
             traj.astype(jnp.float32).reshape(S, B, C, H, W_)], axis=0)
    else:
        x_fin, lpb, lpf = results
        traj_full = None

    return {
        'x_mean_posterior': x_fin.reshape(B, C, H, W_),
        'logpf_prior': lpb[:, 0, 0],
        'logpf_posterior': lpf[:, 0, 0],
        'traj': traj_full,
    }


# ----------------------------------------------------------------------------
# Pure-JAX reference of the same forward (for correctness check)
# ----------------------------------------------------------------------------
def rtb_forward_ref(x0, noise, steps, w, bias, epsilon=1e-5, T=1.0):
    B, C, H, W_ = x0.shape
    F = C * H * W_
    x = x0
    lp0 = jnp.sum(-0.5 * x.reshape(B, F) ** 2 - LOG_SQRT_2PI, axis=1)
    logpf = lp0
    logpb = lp0
    dt = -1.0 / (steps + 1)
    t = jnp.full((B,), T, dtype=jnp.float32)
    traj = [x]
    for step in range(steps):
        t = t + dt
        if float(t[0]) < epsilon:
            continue
        beta_t = beta_cosine(t).reshape(B, 1, 1, 1)
        sigma_t = sigma_cosine(t).reshape(B, 1, 1, 1)
        x3 = x.reshape(B, C, H * W_)
        score = (jnp.einsum('cd,bdk->bck', w, x3,
                            precision=jax.lax.Precision.HIGHEST)
                 + bias[None]) * (1.0 + 0.1 * t)[:, None, None]
        score = score.reshape(B, C, H, W_)
        drift = -0.5 * beta_t * x
        g = jnp.sqrt(beta_t)
        post_drift = -drift - beta_t * score / sigma_t
        x_mean_post = x + post_drift * dt
        std = g * np.sqrt(abs(dt))
        eps_n = noise[step]
        x_new = x_mean_post + std * eps_n
        x_mean_pb = x + (-drift) * dt
        lp_pb = -0.5 * ((x_new - x_mean_pb) / std) ** 2 - jnp.log(std) - LOG_SQRT_2PI
        lp_pf = -0.5 * ((x_new - x_mean_post) / std) ** 2 - jnp.log(std) - LOG_SQRT_2PI
        logpb = logpb + jnp.sum(lp_pb.reshape(B, -1), axis=1)
        logpf = logpf + jnp.sum(lp_pf.reshape(B, -1), axis=1)
        x = x_new
        traj.append(x)
    return x, logpb, logpf, jnp.stack(traj, axis=0)


if __name__ == "__main__":
    key = jax.random.PRNGKey(0)
    # small but lane-dense latent: HW = 16*16 = 256 (multiple of 128).
    # (module uses 16x64x64; steps default 100 — small here for the test)
    B, C, H, W = 2, 16, 16, 16
    steps = 8

    kw, kb, kx, kn = jax.random.split(key, 4)
    w = 0.05 * jax.random.normal(kw, (C, C), dtype=jnp.float32)
    bias = 0.01 * jax.random.normal(kb, (C, 1), dtype=jnp.float32)
    x0 = jax.random.normal(kx, (B, C, H, W), dtype=jnp.float32)
    noise = jax.random.normal(kn, (steps, B, C, H, W), dtype=jnp.float32)

    logs = rtb_forward(x0, noise, w, bias, steps=steps, save_traj=True)
    x_final = jax.block_until_ready(logs['x_mean_posterior'])
    logpb = np.asarray(logs['logpf_prior'])
    logpf = np.asarray(logs['logpf_posterior'])
    traj = np.asarray(logs['traj'])

    # Pure-JAX reference check
    x_ref, logpb_ref, logpf_ref, traj_ref = rtb_forward_ref(x0, noise, steps, w, bias)
    np.testing.assert_allclose(np.asarray(x_final), np.asarray(x_ref),
                               rtol=1e-2, atol=1e-2)
    np.testing.assert_allclose(logpb, np.asarray(logpb_ref), rtol=1e-2, atol=1.0)
    np.testing.assert_allclose(logpf, np.asarray(logpf_ref), rtol=1e-2, atol=1.0)
    np.testing.assert_allclose(traj, np.asarray(traj_ref), rtol=1e-2, atol=1e-2)

    print("KERNEL_OK")
</pallas_src>

<mosaic_0001>
module attributes {stable_mosaic.version = 11 : i64} {
  func.func @_rtb_fused_kernel(%arg0: i32, %arg1: i32, %arg2: memref<5x8xf32, #tpu.memory_space<smem>>, %arg3: memref<1x16x256xf32, #tpu.memory_space<vmem>>, %arg4: memref<1x1x16x256xf32, #tpu.memory_space<vmem>>, %arg5: memref<16x16xf32, #tpu.memory_space<vmem>>, %arg6: memref<16x1xf32, #tpu.memory_space<vmem>>, %arg7: memref<1x16x256xf32, #tpu.memory_space<vmem>>, %arg8: memref<1x1x1xf32, #tpu.memory_space<vmem>>, %arg9: memref<1x1x1xf32, #tpu.memory_space<vmem>>, %arg10: memref<1x1x16x256xf32, #tpu.memory_space<vmem>>) attributes {dimension_semantics = [#tpu.dimension_semantics<parallel>, #tpu.dimension_semantics<arbitrary>], iteration_bounds = array<i64: 2, 8>, scalar_prefetch = 0 : i64, scratch_operands = 0 : i64, tpu.core_type = #tpu.core_type<tc>, window_params = [{transform_indices = @transform_0, window_bounds = array<i64: 5, 8>}, {transform_indices = @transform_1, window_bounds = array<i64: 1, 16, 256>}, {transform_indices = @transform_2, window_bounds = array<i64: 1, 1, 16, 256>}, {pipeline_mode = #tpu.pipeline_mode<synchronous>, transform_indices = @transform_3, window_bounds = array<i64: 16, 16>}, {pipeline_mode = #tpu.pipeline_mode<synchronous>, transform_indices = @transform_4, window_bounds = array<i64: 16, 1>}, {transform_indices = @transform_5, window_bounds = array<i64: 1, 16, 256>}, {transform_indices = @transform_6, window_bounds = array<i64: 1, 1, 1>}, {transform_indices = @transform_7, window_bounds = array<i64: 1, 1, 1>}, {transform_indices = @transform_8, window_bounds = array<i64: 1, 1, 16, 256>}]} {
    %c0_i32 = arith.constant 0 : i32
    %0 = arith.cmpi eq, %arg1, %c0_i32 : i32
    %1 = arith.extui %0 : i1 to i32
    %c0_i32_0 = arith.constant 0 : i32
    %2 = arith.cmpi ne, %1, %c0_i32_0 : i32
    scf.if %2 {
      %c0_35 = arith.constant 0 : index
      %c0_36 = arith.constant 0 : index
      %c0_37 = arith.constant 0 : index
      %58 = vector.load %arg3[%c0_35, %c0_36, %c0_37] : memref<1x16x256xf32, #tpu.memory_space<vmem>>, vector<1x16x256xf32>
      %59 = arith.mulf %58, %58 : vector<1x16x256xf32>
      %cst_38 = arith.constant dense<0.000000e+00> : vector<1xf32>
      %60 = vector.multi_reduction <add>, %59, %cst_38 [1, 2] : vector<1x16x256xf32> to vector<1xf32>
      %61 = vector.shape_cast %60 : vector<1xf32> to vector<1x1x1xf32>
      %cst_39 = arith.constant -5.000000e-01 : f32
      %62 = vector.broadcast %cst_39 : f32 to vector<1x1x1xf32>
      %63 = arith.mulf %62, %61 : vector<1x1x1xf32>
      %cst_40 = arith.constant -3763.97217 : f32
      %64 = vector.broadcast %cst_40 : f32 to vector<1x1x1xf32>
      %65 = arith.addf %63, %64 : vector<1x1x1xf32>
      %c0_41 = arith.constant 0 : index
      %c0_42 = arith.constant 0 : index
      %c0_43 = arith.constant 0 : index
      %66 = vector.load %arg7[%c0_41, %c0_42, %c0_43] : memref<1x16x256xf32, #tpu.memory_space<vmem>>, vector<1x16x256xf32>
      tpu.vector_store %arg7[%c0_41, %c0_42, %c0_43], %58 {strides = array<i32>} : memref<1x16x256xf32, #tpu.memory_space<vmem>>, vector<1x16x256xf32>,
      %c0_44 = arith.constant 0 : index
      %c0_45 = arith.constant 0 : index
      %c0_46 = arith.constant 0 : index
      %67 = vector.load %arg8[%c0_44, %c0_45, %c0_46] : memref<1x1x1xf32, #tpu.memory_space<vmem>>, vector<1x1x1xf32>
      tpu.vector_store %arg8[%c0_44, %c0_45, %c0_46], %65 {strides = array<i32>} : memref<1x1x1xf32, #tpu.memory_space<vmem>>, vector<1x1x1xf32>,
      %c0_47 = arith.constant 0 : index
      %c0_48 = arith.constant 0 : index
      %c0_49 = arith.constant 0 : index
      %68 = vector.load %arg9[%c0_47, %c0_48, %c0_49] : memref<1x1x1xf32, #tpu.memory_space<vmem>>, vector<1x1x1xf32>
      tpu.vector_store %arg9[%c0_47, %c0_48, %c0_49], %65 {strides = array<i32>} : memref<1x1x1xf32, #tpu.memory_space<vmem>>, vector<1x1x1xf32>,
    } else {
    }
    %c0 = arith.constant 0 : index
    %3 = arith.index_cast %arg1 : i32 to index
    %4 = memref.load %arg2[%c0, %3] : memref<5x8xf32, #tpu.memory_space<smem>>
    %c1 = arith.constant 1 : index
    %5 = arith.index_cast %arg1 : i32 to index
    %6 = memref.load %arg2[%c1, %5] : memref<5x8xf32, #tpu.memory_space<smem>>
    %c2 = arith.constant 2 : index
    %7 = arith.index_cast %arg1 : i32 to index
    %8 = memref.load %arg2[%c2, %7] : memref<5x8xf32, #tpu.memory_space<smem>>
    %c3 = arith.constant 3 : index
    %9 = arith.index_cast %arg1 : i32 to index
    %10 = memref.load %arg2[%c3, %9] : memref<5x8xf32, #tpu.memory_space<smem>>
    %c4 = arith.constant 4 : index
    %11 = arith.index_cast %arg1 : i32 to index
    %12 = memref.load %arg2[%c4, %11] : memref<5x8xf32, #tpu.memory_space<smem>>
    %c0_1 = arith.constant 0 : index
    %c0_2 = arith.constant 0 : index
    %c0_3 = arith.constant 0 : index
    %13 = vector.load %arg7[%c0_1, %c0_2, %c0_3] : memref<1x16x256xf32, #tpu.memory_space<vmem>>, vector<1x16x256xf32>
    %c0_4 = arith.constant 0 : index
    %c0_5 = arith.constant 0 : index
    %c0_6 = arith.constant 0 : index
    %c0_7 = arith.constant 0 : index
    %14 = vector.load %arg4[%c0_4, %c0_5, %c0_6, %c0_7] : memref<1x1x16x256xf32, #tpu.memory_space<vmem>>, vector<1x1x16x256xf32>
    %15 = vector.shape_cast %14 : vector<1x1x16x256xf32> to vector<1x16x256xf32>
    %c0_8 = arith.constant 0 : index
    %c0_9 = arith.constant 0 : index
    %16 = vector.load %arg5[%c0_8, %c0_9] : memref<16x16xf32, #tpu.memory_space<vmem>>, vector<16x16xf32>
    %17 = vector.broadcast %6 : f32 to vector<16x16xf32>
    %18 = arith.mulf %17, %16 : vector<16x16xf32>
    %c0_10 = arith.constant 0 : index
    %c0_11 = arith.constant 0 : index
    %19 = vector.load %arg6[%c0_10, %c0_11] : memref<16x1xf32, #tpu.memory_space<vmem>>, vector<16x1xf32>
    %20 = vector.broadcast %6 : f32 to vector<16x1xf32>
    %21 = arith.mulf %20, %19 : vector<16x1xf32>
    %22 = vector.shape_cast %18 : vector<16x16xf32> to vector<1x16x16xf32>
    "tpu.trace_start"() <{level = 10 : i32, message = "bcd,bdk->bck"}> : () -> ()
    %cst = arith.constant dense<0.000000e+00> : vector<1x16x256xf32>
    %23 = tpu.matmul %22, %13, %cst {dimension_numbers = #tpu.dot_dimension_numbers<[2], [1], [1], [2], [0, 0, 0, 1, 1, 2], [0], [0]>} : vector<1x16x16xf32>, vector<1x16x256xf32>, vector<1x16x256xf32> -> vector<1x16x256xf32>
    "tpu.trace_stop"() : () -> ()
    %24 = vector.shape_cast %21 : vector<16x1xf32> to vector<1x16x1xf32>
    %25 = vector.broadcast %24 : vector<1x16x1xf32> to vector<1x16x256xf32>
    %26 = arith.addf %23, %25 : vector<1x16x256xf32>
    %27 = vector.broadcast %8 : f32 to vector<1x16x256xf32>
    %28 = arith.mulf %27, %15 : vector<1x16x256xf32>
    %29 = arith.addf %28, %26 : vector<1x16x256xf32>
    %30 = vector.broadcast %4 : f32 to vector<1x16x256xf32>
    %31 = arith.mulf %30, %13 : vector<1x16x256xf32>
    %32 = arith.addf %31, %29 : vector<1x16x256xf32>
    %c0_12 = arith.constant 0 : index
    %c0_13 = arith.constant 0 : index
    %c0_14 = arith.constant 0 : index
    %33 = vector.load %arg9[%c0_12, %c0_13, %c0_14] : memref<1x1x1xf32, #tpu.memory_space<vmem>>, vector<1x1x1xf32>
    %34 = arith.mulf %15, %15 : vector<1x16x256xf32>
    %cst_15 = arith.constant dense<0.000000e+00> : vector<1xf32>
    %35 = vector.multi_reduction <add>, %34, %cst_15 [1, 2] : vector<1x16x256xf32> to vector<1xf32>
    %36 = vector.shape_cast %35 : vector<1xf32> to vector<1x1x1xf32>
    %cst_16 = arith.constant -5.000000e-01 : f32
    %37 = vector.broadcast %cst_16 : f32 to vector<1x1x1xf32>
    %38 = arith.mulf %37, %36 : vector<1x1x1xf32>
    %39 = vector.broadcast %12 : f32 to vector<1x1x1xf32>
    %40 = arith.addf %38, %39 : vector<1x1x1xf32>
    %41 = arith.addf %33, %40 : vector<1x1x1xf32>
    %c0_17 = arith.constant 0 : index
    %c0_18 = arith.constant 0 : index
    %c0_19 = arith.constant 0 : index
    %42 = vector.load %arg9[%c0_17, %c0_18, %c0_19] : memref<1x1x1xf32, #tpu.memory_space<vmem>>, vector<1x1x1xf32>
    tpu.vector_store %arg9[%c0_17, %c0_18, %c0_19], %41 {strides = array<i32>} : memref<1x1x1xf32, #tpu.memory_space<vmem>>, vector<1x1x1xf32>,
    %c0_20 = arith.constant 0 : index
    %c0_21 = arith.constant 0 : index
    %c0_22 = arith.constant 0 : index
    %43 = vector.load %arg8[%c0_20, %c0_21, %c0_22] : memref<1x1x1xf32, #tpu.memory_space<vmem>>, vector<1x1x1xf32>
    %cst_23 = arith.constant -5.000000e-01 : f32
    %44 = arith.mulf %cst_23, %10 : f32
    %45 = arith.mulf %29, %29 : vector<1x16x256xf32>
    %cst_24 = arith.constant dense<0.000000e+00> : vector<1xf32>
    %46 = vector.multi_reduction <add>, %45, %cst_24 [1, 2] : vector<1x16x256xf32> to vector<1xf32>
    %47 = vector.shape_cast %46 : vector<1xf32> to vector<1x1x1xf32>
    %48 = vector.broadcast %44 : f32 to vector<1x1x1xf32>
    %49 = arith.mulf %48, %47 : vector<1x1x1xf32>
    %50 = vector.broadcast %12 : f32 to vector<1x1x1xf32>
    %51 = arith.addf %49, %50 : vector<1x1x1xf32>
    %52 = arith.addf %43, %51 : vector<1x1x1xf32>
    %c0_25 = arith.constant 0 : index
    %c0_26 = arith.constant 0 : index
    %c0_27 = arith.constant 0 : index
    %53 = vector.load %arg8[%c0_25, %c0_26, %c0_27] : memref<1x1x1xf32, #tpu.memory_space<vmem>>, vector<1x1x1xf32>
    tpu.vector_store %arg8[%c0_25, %c0_26, %c0_27], %52 {strides = array<i32>} : memref<1x1x1xf32, #tpu.memory_space<vmem>>, vector<1x1x1xf32>,
    %c0_28 = arith.constant 0 : index
    %c0_29 = arith.constant 0 : index
    %c0_30 = arith.constant 0 : index
    %54 = vector.load %arg7[%c0_28, %c0_29, %c0_30] : memref<1x16x256xf32, #tpu.memory_space<vmem>>, vector<1x16x256xf32>
    tpu.vector_store %arg7[%c0_28, %c0_29, %c0_30], %32 {strides = array<i32>} : memref<1x16x256xf32, #tpu.memory_space<vmem>>, vector<1x16x256xf32>,
    %c0_31 = arith.constant 0 : index
    %c0_32 = arith.constant 0 : index
    %c0_33 = arith.constant 0 : index
    %c0_34 = arith.constant 0 : index
    %55 = vector.load %arg10[%c0_31, %c0_32, %c0_33, %c0_34] : memref<1x1x16x256xf32, #tpu.memory_space<vmem>>, vector<1x1x16x256xf32>
    %56 = vector.shape_cast %55 : vector<1x1x16x256xf32> to vector<1x16x256xf32>
    %57 = vector.shape_cast %32 : vector<1x16x256xf32> to vector<1x1x16x256xf32>
    tpu.vector_store %arg10[%c0_31, %c0_32, %c0_33, %c0_34], %57 {strides = array<i32>} : memref<1x1x16x256xf32, #tpu.memory_space<vmem>>, vector<1x1x16x256xf32>,
    return
  }
  func.func @transform_0(%arg0: i32, %arg1: i32) -> (i32, i32) {
    %c0_i32 = arith.constant 0 : i32
    %c0_i32_0 = arith.constant 0 : i32
    %c0_i32_1 = arith.constant 0 : i32
    return %c0_i32, %c0_i32_0 : i32, i32
  }
  func.func @transform_1(%arg0: i32, %arg1: i32) -> (i32, i32, i32) {
    %c0_i32 = arith.constant 0 : i32
    %c0_i32_0 = arith.constant 0 : i32
    %c0_i32_1 = arith.constant 0 : i32
    return %arg0, %c0_i32, %c0_i32_0 : i32, i32, i32
  }
  func.func @transform_2(%arg0: i32, %arg1: i32) -> (i32, i32, i32, i32) {
    %c0_i32 = arith.constant 0 : i32
    %c0_i32_0 = arith.constant 0 : i32
    %c0_i32_1 = arith.constant 0 : i32
    return %arg1, %arg0, %c0_i32, %c0_i32_0 : i32, i32, i32, i32
  }
  func.func @transform_3(%arg0: i32, %arg1: i32) -> (i32, i32) {
    %c0_i32 = arith.constant 0 : i32
    %c0_i32_0 = arith.constant 0 : i32
    %c0_i32_1 = arith.constant 0 : i32
    return %c0_i32, %c0_i32_0 : i32, i32
  }
  func.func @transform_4(%arg0: i32, %arg1: i32) -> (i32, i32) {
    %c0_i32 = arith.constant 0 : i32
    %c0_i32_0 = arith.constant 0 : i32
    %c0_i32_1 = arith.constant 0 : i32
    return %c0_i32, %c0_i32_0 : i32, i32
  }
  func.func @transform_5(%arg0: i32, %arg1: i32) -> (i32, i32, i32) {
    %c0_i32 = arith.constant 0 : i32
    %c0_i32_0 = arith.constant 0 : i32
    %c0_i32_1 = arith.constant 0 : i32
    return %arg0, %c0_i32, %c0_i32_0 : i32, i32, i32
  }
  func.func @transform_6(%arg0: i32, %arg1: i32) -> (i32, i32, i32) {
    %c0_i32 = arith.constant 0 : i32
    %c0_i32_0 = arith.constant 0 : i32
    %c0_i32_1 = arith.constant 0 : i32
    return %arg0, %c0_i32, %c0_i32_0 : i32, i32, i32
  }
  func.func @transform_7(%arg0: i32, %arg1: i32) -> (i32, i32, i32) {
    %c0_i32 = arith.constant 0 : i32
    %c0_i32_0 = arith.constant 0 : i32
    %c0_i32_1 = arith.constant 0 : i32
    return %arg0, %c0_i32, %c0_i32_0 : i32, i32, i32
  }
  func.func @transform_8(%arg0: i32, %arg1: i32) -> (i32, i32, i32, i32) {
    %c0_i32 = arith.constant 0 : i32
    %c0_i32_0 = arith.constant 0 : i32
    %c0_i32_1 = arith.constant 0 : i32
    return %arg1, %arg0, %c0_i32, %c0_i32_0 : i32, i32, i32, i32
  }
}

</mosaic_0001>

<bundles_post_ra>
// kernel: rtb_forward.1
= control target key start
LH: loop header
LB: loop body
LE: loop exit
PB: predicated region body
PF: predicated region fallthrough
CT: control target
= control target key end

     0   :  { %s1212_s0 = inlined_call_operand.vmem [shape: f32[5,8], index: 0, kind: input, shape index: {}]   ;;  %s1213_s1 = inlined_call_operand.vmem [shape: f32[2,16,256], index: 1, kind: input, shape index: {}]   ;;  %s1214_s2 = inlined_call_operand.vmem [shape: f32[8,2,16,256], index: 2, kind: input, shape index: {}]   ;;  %s1215_s3 = inlined_call_operand.vmem [shape: f32[16,16], index: 3, kind: input, shape index: {}]   ;;  %s1216_s4 = inlined_call_operand.vmem [shape: f32[16,1], index: 4, kind: input, shape index: {}]   ;;  %s1217_s5 = inlined_call_operand.vmem [shape: f32[2,16,256], index: 5, kind: output, shape index: {0}]   ;;  %s1218_s6 = inlined_call_operand.vmem [shape: f32[2,1,1], index: 6, kind: output, shape index: {1}]   ;;  %s1219_s7 = inlined_call_operand.vmem [shape: f32[2,1,1], index: 7, kind: output, shape index: {2}]   ;;  %s1220_s8 = inlined_call_operand.vmem [shape: f32[8,2,16,256], index: 8, kind: output, shape index: {3}]  }
   0x1   :  { %1221 = sst [smem:[#allocation7_spill]] %s1212_s0 }
   0x2   :  { %14 = vsyncpa [#allocation3], 0  ;;  %s1045_s27 = smov 0   ;;  %s1047_s28 = smov 0  }
   0x3   :  { %s1049_s29 = smov 0   ;;  %s1051_s30 = smov 0  }
   0x4   :  { %s1053_s9 = smov 0  }
   0x5 LB: > { %s842_s10 = sadd.s32 4294967295, %s995_s9   ;;  %s29_s11 = sadd.s32 1, %s987_s29  ;;  %s995_s9 = sphi %s1053_s9, %s20_s9   ;;  %s991_s30 = sphi %s1051_s30, %s1232_s30   ;;  %s987_s29 = sphi %s1049_s29, %s1231_s29   ;;  %s983_s28 = sphi %s1047_s28, %s1230_s28   ;;  %s979_s27 = sphi %s1045_s27, %s1229_s27  }
   0x6   : > { %p30_p0 = scmp.ge.s32.totalorder %s29_s11, 8  ;;  %s32_s12 = sadd.s32 1, %s991_s30 }
   0x7   : > { %p844_p1 = scmp.ge.s32.totalorder %s995_s9, 1  ;;  %p260_p2 = scmp.lt.s32.totalorder %s995_s9, 17 }
   0x8   : > { %s1234_s11 = smov (%p30_p0, %s29_s11), 0  ;;  %s1236_s12 = smov (!%p30_p0, %s32_s12), %s991_s30 }
   0x9   : > { %1222 = sst [smem:[#allocation5_spill]] %s1234_s11  ;;  %p1078_p3 = pnand %p844_p1, %p260_p2 }
   0xa   : > { %p34_p4 = scmp.ge.s32.totalorder %s1236_s12, 2  ;;  %p1082_p5 = scmp.eq.s32.totalorder %s842_s10, 0 }
   0xb   : > { %p888_p6 = pneg %p1078_p3  ;;  %s1225_s0 = sld [smem:[#allocation7_spill]] }
   0xc   : > { %s1238_s12 = smov (%p34_p4, %s1236_s12), 0 }
   0xd   : > { %1226 = sst [smem:[#allocation6_spill]] %s1238_s12  ;;  %p889_p7 = pnand %p1082_p5, %p888_p6 }
   0xf   : > { %p940_p9 = pneg %p889_p7 }
  0x11   : > { %s273_s17 = sshll.u32 %s1225_s0, 4  ;;  %s274_s17 = int_to_ptr.vmem [resolvable:$true] %s273_s17 }
  0x12   : > { %s938_s18 = scalar_lea.vmem %s274_s17, 128  ;;  %p946_p12 = scmp.lt.s32.totalorder %s274_s17, %s274_s17 }
  0x13   : > { %p939_p8 = scmp.ne.s32.totalorder %s274_s17, %s938_s18  ;;  %p947_p13 = scmp.lt.s32.totalorder %s938_s18, %s938_s18 }
  0x15   : > { %p941_p10 = pnand %p940_p9, %p939_p8  ;;  %p948_p0 = por %p947_p13, %p946_p12 }
  0x17   : > { %p942_p11 = pneg %p941_p10 }
  0x19   : > { %p949_p1 = pnand %p948_p0, %p942_p11 }
  0x1b   : > { %952 = shalt.err (!%p949_p1)
}
  0x1c   : > { %s997_s19 = smov [#allocation2]   ;;  %312 = sbr.rel (%p1078_p3) target bundleno = 611 (0x263), region = 40 }
  0x1d   : > { %891 = dma.vmem_to_smem (!%p889_p7), %s274_s17, 128, %s997_s19, [#allocation3]  }
  0x23   : > { %974 = dma.done.wait (%p1082_p5), [#allocation3], 128  }
  0x24   : > { %976 = vsyncadd (%p1082_p5), [#allocation3], 4294967168 }
  0x25   : > { %318 = sfence }
  0x26   : > { %p371_p2 = scmp.lt.s32.totalorder %s983_s28, 1  ;;  %p376_p4 = scmp.lt.s32.totalorder %s979_s27, 7 }
  0x27   : > { %p859_p3 = scmp.ne.s32.totalorder %s979_s27, 0 }
  0x28   : > { %s1240_s28 = smov (!%p371_p2, %s983_s28), 1  ;;  %vm434_vm0 = vcmask (!%p859_p3), 0  }
  0x29   : > { %s377_s20 = scalar_select %p376_p4, %s979_s27, 7 }
  0x2a   : > { %s868_s21 = sshll.u32 %s1240_s28, 5  ;;  %s851_s22 = sshll.u32 %s1240_s28, 2 }
  0x2b   : > { %s375_s25 = scalar_lea.vmem %s1213_s1, %s868_s21  ;;  %s852_s26 = sshll.u32 %s377_s20, 3 }
  0x2c   : > { %s382_s10 = sadd.s32 %s852_s26, %s851_s22  ;;  %s1111_s15 = scalar_lea.vmem %s1217_s5, %s868_s21  ;;  %v409_v0 = vld [vmem:[%s375_s25] sm:$0xff] (!%p859_p3)  ;;  %v410_v1 = vld [vmem:[%s375_s25 + $0x8] sm:$0xff] (!%p859_p3)  ;;  %v411_v2 = vld [vmem:[%s375_s25 + $0x10] sm:$0xff] (!%p859_p3) }
  0x2d   : > { %s853_s16 = sshll.u32 %s382_s10, 3  ;;  %s1116_s19 = scalar_lea.vmem %s1218_s6, %s1240_s28  ;;  %v412_v3 = vld [vmem:[%s375_s25 + $0x18] sm:$0xff] (!%p859_p3)  ;;  %v413_v4 = vmul.f32 (!%p859_p3), %v409_v0, %v409_v0  ;;  %v414_v5 = vmul.f32 (!%p859_p3), %v410_v1, %v410_v1  ;;  %v415_v6 = vmul.f32 (!%p859_p3), %v411_v2, %v411_v2  ;;  %430 = vst [vmem:[%s1111_s15] sm:$0xff] (!%p859_p3), %v409_v0  ;;  %431 = vst [vmem:[%s1111_s15 + $0x8] sm:$0xff] (!%p859_p3), %v410_v1 }
  0x2e   : > { %s1121_s11 = scalar_lea.vmem %s1214_s2, %s853_s16  ;;  %s1126_s20 = scalar_lea.vmem %s1219_s7, %s1240_s28  ;;  %432 = vst [vmem:[%s1111_s15 + $0x10] sm:$0xff] (!%p859_p3), %v411_v2  ;;  %433 = vst [vmem:[%s1111_s15 + $0x18] sm:$0xff] (!%p859_p3), %v412_v3  ;;  %v416_v7 = vmul.f32 (!%p859_p3), %v412_v3, %v412_v3 }
  0x2f   : > { %s1131_s21 = scalar_lea.vmem %s1220_s8, %s853_s16  ;;  %408 = sbr.rel (%p859_p3) target bundleno = 212 (0xd4), region = 48  ;;  %v417_v8 = vadd.f32 (!%p859_p3), %v414_v5, %v413_v4 }
  0x31   : > { %v418_v9 = vadd.f32 (!%p859_p3), %v417_v8, %v415_v6 }
  0x33   : > { %v419_v10 = vadd.f32 (!%p859_p3), %v418_v9, %v416_v7 }
  0x35   : > { %420 = vadd.xlane.f32.xlu0 (!%p859_p3), %v419_v10 }
  0xc2   : > { %v421_v11 = vpop.xlane.xlu0 %420 }
  0xc3   : > { %v422_v12 = vrot.slane %v421_v11, 4 }
  0xc5   : > { %v423_v13 = vadd.f32 %v422_v12, %v421_v11 }
  0xc7   : > { %v424_v14 = vrot.slane %v423_v13, 2 }
  0xc9   : > { %v425_v15 = vadd.f32 %v424_v14, %v423_v13 }
  0xcb   : > { %v426_v16 = vrot.slane %v425_v15, 1 }
  0xcd   : > { %v427_v17 = vadd.f32 %v426_v16, %v425_v15 }
  0xcf   : > { %v428_v18 = vmul.f32 -0.5, %v427_v17 }
  0xd1   : > { %v429_v19 = vadd.f32 -3763.9722, %v428_v18 }
  0xd3   : > { %435 = vst.msk [vmem:[%s1116_s19] sm:$0x1] %vm434_vm0, %v429_v19  ;;  %436 = vst.msk [vmem:[%s1126_s20] sm:$0x1] %vm434_vm0, %v429_v19 }
  0xd4 PF: > { %v1141_v20 = vld [vmem:[%s1111_s15 + $0x8] sm:$0xff]  ;;  %v1144_v21 = vld [vmem:[%s1111_s15 + $0x18] sm:$0xff]  ;;  %v458_v22 = vld [vmem:[%s1111_s15] sm:$0xff]  ;;  %s438_s0 = sshra.s32 %s979_s27, 7  ;;  %v998_v25 = vmov 0.0   ;;  %s1154_s12 = sand.u32 127, %s979_s27 }
  0xd5   : > { %v878_v23 = vpack.c.bf16 %v1144_v21, %v1141_v20  ;;  %v460_v24 = vld [vmem:[%s1111_s15 + $0x10] sm:$0xff]  ;;  %556 = vmatprep.mubr.f32.mxu0 %v998_v25  ;;  %562 = vmatprep.mubr.f32.mxu1 %v998_v25  ;;  %s1151_s28 = sshll.u32 %s438_s0, 7  ;;  %v999_v27 = vmov 0   ;;  %v466_v28 = vld [vmem:[%s1215_s3] sm:$0xff]  ;;  %v467_v29 = vld [vmem:[%s1215_s3 + $0x8] sm:$0xff]  ;;  %vm485_vm1 = vcmask 130048  }
  0xd6   : > { %v880_v26 = vpack.c.bf16 %v460_v24, %v458_v22  ;;  %s871_s25 = sadd.s32 128, %s1151_s28  ;;  %937 = vset.pattern.permute.xlu0 %v999_v27  ;;  %v471_v30 = vld [vmem:[%s1216_s4] sm:$0xff]  ;;  %v472_v35 = vld [vmem:[%s1216_s4 + $0x8] sm:$0xff]  ;;  %v464_v41 = vld [vmem:[%s1121_s11 + $0x10] sm:$0xff]  ;;  %s873_s0 = sadd.s32 256, %s1151_s28  ;;  %vm607_vm2 = vcmask 0  }
  0xd7   : > { %879 = vmatprep.subr.bf16.mxu0 %v878_v23  ;;  %882 = vmatprep.subr.bf16.mxu1 %v878_v23  ;;  %s444_s10 = sadd.s32 %s871_s25, %s1154_s12  ;;  %v462_v37 = vld [vmem:[%s1121_s11] sm:$0xff]  ;;  %v463_v38 = vld [vmem:[%s1121_s11 + $0x8] sm:$0xff]  ;;  %v590_v42 = vmul.f32 %v464_v41, %v464_v41  ;;  %v465_v44 = vld [vmem:[%s1121_s11 + $0x18] sm:$0xff]  ;;  %s448_s25 = sadd.s32 %s873_s0, %s1154_s12 }
  0xd8   : > { %881 = vmatpush1.bf16.msra.mxu0 %v880_v26  ;;  %883 = vmatpush1.bf16.msra.mxu1 %v880_v26  ;;  %s445_s13 = sld [smem:[#allocation2 + %s444_s10]]  ;;  %v588_v39 = vmul.f32 %v462_v37, %v462_v37  ;;  %v589_v40 = vmul.f32 %v463_v38, %v463_v38  ;;  %v591_v45 = vmul.f32 %v465_v44, %v465_v44 }
  0xd9   : > { %s449_s10 = sld [smem:[#allocation2 + %s448_s25]] }
  0xda   : > { %v592_v43 = vadd.f32 %v589_v40, %v588_v39  ;;  %v609_v40 = vld [vmem:[%s1116_s19] sm:$0x1] }
  0xdc   : > { %v593_v46 = vadd.f32 %v592_v43, %v590_v42 }
  0xde   : > { %v468_v31 = vstv %s445_s13  ;;  %v594_v47 = vadd.f32 %v593_v46, %v591_v45  ;;  %s437_s13 = sld [smem:[#allocation2 + %s979_s27]]  ;;  %s877_s27 = sadd.s32 512, %s1151_s28 }
  0xdf   : > { %v469_v32 = vmul.f32 %v468_v31, %v466_v28  ;;  %v470_v33 = vmul.f32 %v468_v31, %v467_v29  ;;  %v473_v34 = vmul.f32 %v471_v30, %v468_v31  ;;  %v474_v36 = vmul.f32 %v472_v35, %v468_v31  ;;  %s456_s11 = sadd.s32 %s877_s27, %s1154_s12  ;;  %v587_v28 = vld [vmem:[%s1126_s20] sm:$0x1] }
  0xe0   : > { %595 = vadd.xlane.f32.xlu1 %v594_v47  ;;  %v569_v49 = vstv %s449_s10  ;;  %s457_s14 = sld [smem:[#allocation2 + %s456_s11]] }
  0xe1   : > { %864 = vmatmul.mubr.msk.f32.vlgmr.msra.gmra.mrb[0].mxu0 %vm485_vm1, %v469_v32  ;;  %865 = vmatmul.mubr.msk.f32.vlgmr.msra.gmra.mrb[0].mxu1 %vm485_vm1, %v470_v33  ;;  %v570_v52 = vmul.f32 %v569_v49, %v462_v37  ;;  %v572_v53 = vmul.f32 %v569_v49, %v464_v41  ;;  %v571_v56 = vmul.f32 %v569_v49, %v463_v38 }
  0xe2   : > { %477 = vperm.xlu0 %937, %v473_v34   ;;  %v573_v57 = vmul.f32 %v569_v49, %v465_v44 }
  0xe4   : > { %v578_v50 = vstv %s437_s13 }
  0xe5   : > { %v579_v58 = vmul.f32 %v578_v50, %v458_v22  ;;  %v581_v59 = vmul.f32 %v578_v50, %v460_v24  ;;  %v580_v0 = vmul.f32 %v578_v50, %v1141_v20  ;;  %v582_v1 = vmul.f32 %v578_v50, %v1144_v21 }
  0xe6   : > { %482 = vperm.xlu0 %937, %v474_v36   ;;  %v604_v26 = vstv %s457_s14 }
 0x161   : > { %v478_v48 = vpop.permute.xlu0 %477 }
 0x165   : > { %v483_v51 = vpop.permute.xlu0 %482 }
 0x16d   : > { %v596_v19 = vpop.xlane.xlu1 %595 }
 0x16e   : > { %v597_v20 = vrot.slane %v596_v19, 4 }
 0x170   : > { %v598_v21 = vadd.f32 %v597_v20, %v596_v19 }
 0x172   : > { %v599_v22 = vrot.slane %v598_v21, 2 }
 0x174   : > { %v600_v23 = vadd.f32 %v599_v22, %v598_v21 }
 0x176   : > { %v601_v24 = vrot.slane %v600_v23, 1 }
 0x178   : > { %v602_v25 = vadd.f32 %v601_v24, %v600_v23 }
 0x17a   : > { %v603_v27 = vmul.f32 -0.5, %v602_v25 }
 0x17c   : > { %v605_v29 = vadd.f32 %v604_v26, %v603_v27 }
 0x17e   : > { %v606_v30 = vadd.f32 %v605_v29, %v587_v28 }
 0x180   : > { %608 = vst.msk [vmem:[%s1126_s20] sm:$0x1] %vm607_vm2, %v606_v30 }
 0x1b4   : > { %v558_v54 = vpop.f32.mrb[0].mxu0  ;;  %v564_v55 = vpop.f32.mrb[0].mxu1 }
 0x1b5   : > { %v559_v60 = vadd.f32 %v558_v54, %v478_v48  ;;  %v565_v61 = vadd.f32 %v564_v55, %v483_v51  ;;  %v560_v62 = vpop.f32.mrb[1].mxu0  ;;  %v566_v63 = vpop.f32.mrb[1].mxu1 }
 0x1b6   : > { %v561_v2 = vadd.f32 %v560_v62, %v478_v48  ;;  %v567_v3 = vadd.f32 %v566_v63, %v483_v51 }
 0x1b7   : > { %v574_v4 = vadd.f32 %v570_v52, %v559_v60  ;;  %v576_v5 = vadd.f32 %v572_v53, %v565_v61 }
 0x1b8   : > { %v575_v6 = vadd.f32 %v571_v56, %v561_v2  ;;  %v577_v7 = vadd.f32 %v573_v57, %v567_v3 }
 0x1b9   : > { %v583_v8 = vadd.f32 %v579_v58, %v574_v4  ;;  %v611_v9 = vmul.f32 %v574_v4, %v574_v4  ;;  %v585_v10 = vadd.f32 %v581_v59, %v576_v5  ;;  %v613_v14 = vmul.f32 %v576_v5, %v576_v5 }
 0x1ba   : > { %v584_v11 = vadd.f32 %v580_v0, %v575_v6  ;;  %v612_v12 = vmul.f32 %v575_v6, %v575_v6  ;;  %v586_v13 = vadd.f32 %v582_v1, %v577_v7  ;;  %v614_v16 = vmul.f32 %v577_v7, %v577_v7 }
 0x1bb   : > { %631 = vst [vmem:[%s1111_s15] sm:$0xff] %v583_v8  ;;  %635 = vst [vmem:[%s1131_s21] sm:$0xff] %v583_v8 }
 0x1bc   : > { %633 = vst [vmem:[%s1111_s15 + $0x10] sm:$0xff] %v585_v10  ;;  %637 = vst [vmem:[%s1131_s21 + $0x10] sm:$0xff] %v585_v10  ;;  %v615_v15 = vadd.f32 %v612_v12, %v611_v9 }
 0x1bd   : > { %632 = vst [vmem:[%s1111_s15 + $0x8] sm:$0xff] %v584_v11  ;;  %636 = vst [vmem:[%s1131_s21 + $0x8] sm:$0xff] %v584_v11 }
 0x1be   : > { %634 = vst [vmem:[%s1111_s15 + $0x18] sm:$0xff] %v586_v13  ;;  %638 = vst [vmem:[%s1131_s21 + $0x18] sm:$0xff] %v586_v13  ;;  %v616_v17 = vadd.f32 %v615_v15, %v613_v14  ;;  %s875_s15 = sadd.s32 384, %s1151_s28 }
 0x1bf   : > { %s452_s21 = sadd.s32 %s875_s15, %s1154_s12 }
 0x1c0   : > { %v617_v18 = vadd.f32 %v616_v17, %v614_v16  ;;  %s453_s16 = sld [smem:[#allocation2 + %s452_s21]] }
 0x1c2   : > { %618 = vadd.xlane.f32.xlu1 %v617_v18 }
 0x1c6   : > { %s610_s17 = smul.f32 -0.5, %s453_s16 }
 0x1c8   : > { %v626_v37 = vstv %s610_s17 }
 0x24f   : > { %v619_v31 = vpop.xlane.xlu1 %618 }
 0x250   : > { %v620_v32 = vrot.slane %v619_v31, 4 }
 0x252   : > { %v621_v33 = vadd.f32 %v620_v32, %v619_v31 }
 0x254   : > { %v622_v34 = vrot.slane %v621_v33, 2 }
 0x256   : > { %v623_v35 = vadd.f32 %v622_v34, %v621_v33 }
 0x258   : > { %v624_v36 = vrot.slane %v623_v35, 1 }
 0x25a   : > { %v625_v38 = vadd.f32 %v624_v36, %v623_v35 }
 0x25c   : > { %v627_v39 = vmul.f32 %v626_v37, %v625_v38 }
 0x25e   : > { %v628_v41 = vadd.f32 %v627_v39, %v604_v26 }
 0x260   : > { %v629_v42 = vadd.f32 %v628_v41, %v609_v40 }
 0x262   : > { %630 = vst.msk [vmem:[%s1116_s19] sm:$0x1] %vm607_vm2, %v629_v42 }
 0x263 PF: > { %s20_s9 = sadd.s32 1, %s995_s9   ;;  %s1227_s20 = sld [smem:[#allocation5_spill]] }
 0x264   : > { %p17_p5 = scmp.ge.s32.totalorder %s20_s9, 18   ;;  %s1228_s12 = sld [smem:[#allocation6_spill]] }
 0x265   : > { %s1229_s27 = smov %s987_s29  ;;  %s1230_s28 = smov %s991_s30 }
 0x266   :  { %19 = sbr.rel (!%p17_p5) target bundleno = 5 (0x5), region = 118 }
 0x269   : > { %s1231_s29 = smov %s1227_s20 }
 0x26a   : > { %s1232_s30 = smov %s1228_s12 }
 0x26d   :  { %708 = vsyncpa [#allocation3], 1 }
 0x26e   :  { %710 = vsyncpa [#allocation3 + $0x1], 1 }

</bundles_post_ra>
